<compile_context>
chip_gen: v5e
topology: v5e:2x2
jax: 0.10.0
libtpu: 0.0.40
codegen_flags: <defaults>
</compile_context>

<pallas_src>
import functools

import jax
import jax.numpy as jnp
from jax.experimental import pallas as pl
from jax.experimental.pallas import tpu as pltpu

# Module-level constants mirroring bigram.py.
BATCH_SIZE = 32     # batch_size in the original script
BLOCK_SIZE = 8      # block_size in the original script
VOCAB_SIZE = 65     # stand-in for len(set(text)) (tiny-Shakespeare-like vocab)

LANE = 128          # TPU lane width
MIN_ROWS = 8        # sublane alignment for the second-to-last block dim


def _round_up(x, m):
    return ((x + m - 1) // m) * m


def _pick_layout(n):
    """Pick (chunk, num_chunks, n_pad).  Two parallel grid steps when possible
    (keeps both v7x TensorCores busy); costs one extra tiny step on 1-TC chips."""
    if n >= 2 * MIN_ROWS:
        chunk = _round_up(-(-n // 2), MIN_ROWS)
        num_chunks = 2
    else:
        chunk = _round_up(n, MIN_ROWS)
        num_chunks = 1
    return chunk, num_chunks, chunk * num_chunks


# ---------------------------------------------------------------------------
# Kernels
# ---------------------------------------------------------------------------

def bigram_loss_kernel(ids_ref, emb_ref, lse_ref, logits_ref, loss_ref, *,
                       chunk, n_valid, inv_n, mask_rows):
    """One chunk of: embedding lookup (one-hot @ E on the MXU) + cross-entropy.

    ids_ref:    (chunk, 2)  int32   col 0 = token ids, col 1 = targets
    emb_ref:    (Vp, Vp)    f32     zero-padded table, resident across the grid
    lse_ref:    (1, Vp)     f32     precomputed per-row logsumexp of E (padded 0)
    logits_ref: (chunk, Vp) f32     logits for this chunk (lane-dense store)
    loss_ref:   (1, LANE)   f32     this chunk's normalized loss partial sum,
                                    broadcast across 128 lanes
    """
    vp = emb_ref.shape[1]
    idx = ids_ref[:, 0:1]                                           # (chunk, 1)
    tgt = ids_ref[:, 1:2]                                           # (chunk, 1)

    lane = jax.lax.broadcasted_iota(jnp.int32, (chunk, vp), 1)

    # ---- embedding lookup: one-hot(idx) @ E on the MXU ----
    onehot = (lane == idx).astype(jnp.float32)                      # (chunk, Vp)
    logits = jnp.dot(onehot, emb_ref[...],
                     preferred_element_type=jnp.float32)            # (chunk, Vp)
    logits_ref[...] = logits

    # ---- cross-entropy with a precomputed per-vocab-row LSE (no exp/log here) --
    lse_b = jnp.broadcast_to(lse_ref[...], (chunk, vp))             # (chunk, Vp)
    row_lse = jnp.sum(jnp.where(lane == idx, lse_b, 0.0),
                      axis=-1, keepdims=True)                       # (chunk, 1)
    tgt_logit = jnp.sum(jnp.where(lane == tgt, logits, 0.0),
                        axis=-1, keepdims=True)                     # (chunk, 1)
    per_token = row_lse - tgt_logit                                 # (chunk, 1)

    if mask_rows:  # static: only traced when N was padded up to a chunk multiple
        row = (pl.program_id(0) * chunk
               + jax.lax.broadcasted_iota(jnp.int32, (chunk, 1), 0))
        per_token = jnp.where(row < n_valid, per_token, 0.0)

    partial = jnp.sum(per_token, axis=0, keepdims=True) * inv_n     # (1, 1)
    loss_ref[...] = jnp.broadcast_to(partial, (1, LANE))


def bigram_logits_kernel(idx_ref, emb_ref, logits_ref, *, chunk):
    """Inference-only chunk: embedding lookup, no loss math."""
    vp = emb_ref.shape[1]
    lane = jax.lax.broadcasted_iota(jnp.int32, (chunk, vp), 1)
    onehot = (lane == idx_ref[...]).astype(jnp.float32)             # (chunk, Vp)
    logits_ref[...] = jnp.dot(onehot, emb_ref[...],
                              preferred_element_type=jnp.float32)


# ---------------------------------------------------------------------------
# Forward paths (each jitted once per model instance -> single dispatch)
# ---------------------------------------------------------------------------

def _loss_forward(idx, targets, emb_pad, row_lse_pad, *, vocab_size):
    b, t = idx.shape
    n = b * t
    vp = emb_pad.shape[0]
    chunk, num_chunks, n_pad = _pick_layout(n)

    idx_flat = idx.reshape(n).astype(jnp.int32)
    tgt_flat = targets.reshape(n).astype(jnp.int32)
    ids = (jnp.zeros((n_pad, 2), jnp.int32)
           .at[:n, 0].set(idx_flat)
           .at[:n, 1].set(tgt_flat))
    # TODO(synk): the (chunk, 2) int32 block uses 2/128 lanes; if B*T scales up,
    # switch ids to a lane-dense (2, n_pad) layout or scalar prefetch.

    kernel = functools.partial(bigram_loss_kernel, chunk=chunk, n_valid=n,
                               inv_n=1.0 / float(n), mask_rows=(n_pad != n))
    logits_pad, loss_parts = pl.pallas_call(
        kernel,
        grid=(num_chunks,),
        in_specs=[
            pl.BlockSpec((chunk, 2), lambda i: (i, 0)),   # packed idx+targets
            pl.BlockSpec((vp, vp), lambda i: (0, 0)),     # table resident in VMEM
            pl.BlockSpec((1, vp), lambda i: (0, 0)),      # row LSE resident in VMEM
        ],
        out_specs=(
            pl.BlockSpec((chunk, vp), lambda i: (i, 0)),  # lane-dense logits
            pl.BlockSpec((1, LANE), lambda i: (0, i)),    # per-chunk partial loss
        ),
        out_shape=(
            jax.ShapeDtypeStruct((n_pad, vp), jnp.float32),
            jax.ShapeDtypeStruct((1, num_chunks * LANE), jnp.float32),
        ),
        compiler_params=pltpu.CompilerParams(
            dimension_semantics=("parallel",)),
    )(ids, emb_pad, row_lse_pad)

    # Each chunk's 128 lanes hold the same normalized partial; fold lane 0's.
    loss = loss_parts.reshape(num_chunks, LANE)[:, 0].sum()
    # PyTorch returns the flattened (N, V) logits view when targets are given.
    logits = logits_pad[:n, :vocab_size]
    return logits, loss


def _logits_forward(idx, emb_pad, *, vocab_size):
    b, t = idx.shape
    n = b * t
    vp = emb_pad.shape[0]
    chunk, num_chunks, n_pad = _pick_layout(n)

    idx_col = jnp.zeros((n_pad, 1), jnp.int32).at[:n, 0].set(
        idx.reshape(n).astype(jnp.int32))

    kernel = functools.partial(bigram_logits_kernel, chunk=chunk)
    logits_pad = pl.pallas_call(
        kernel,
        grid=(num_chunks,),
        in_specs=[
            pl.BlockSpec((chunk, 1), lambda i: (i, 0)),
            pl.BlockSpec((vp, vp), lambda i: (0, 0)),     # table resident in VMEM
        ],
        out_specs=pl.BlockSpec((chunk, vp), lambda i: (i, 0)),
        out_shape=jax.ShapeDtypeStruct((n_pad, vp), jnp.float32),
        compiler_params=pltpu.CompilerParams(
            dimension_semantics=("parallel",)),
    )(idx_col, emb_pad)
    return logits_pad[:n, :vocab_size].reshape(b, t, vocab_size)


class BigramModel:
    """JAX/Pallas port of the PyTorch BigramModel (forward only)."""

    def __init__(self, vocab_size, key):
        self.vocab_size = vocab_size
        # nn.Embedding default init: N(0, 1)
        self.embedding = jax.random.normal(key, (vocab_size, vocab_size),
                                           dtype=jnp.float32)
        vp = _round_up(vocab_size, LANE)
        # Zero-padded table (padded rows/cols never selected / sliced off).
        self.emb_pad = jnp.zeros((vp, vp), jnp.float32).at[
            :vocab_size, :vocab_size].set(self.embedding)
        # Precomputed per-vocab-row logsumexp: logits are exactly rows of E,
        # so the per-token LSE inside the kernel becomes a table lookup.
        row_lse = jax.nn.logsumexp(self.embedding, axis=-1)          # (V,)
        self.row_lse_pad = jnp.zeros((1, vp), jnp.float32).at[
            0, :vocab_size].set(row_lse)

        # Jit the whole forward (packing + pallas_call + slicing + reduction)
        # so it is a single dispatch.  vocab_size is baked in as a static int.
        self._loss_fwd = jax.jit(
            functools.partial(_loss_forward, vocab_size=vocab_size))
        self._logits_fwd = jax.jit(
            functools.partial(_logits_forward, vocab_size=vocab_size))

    def forward(self, idx, targets=None):
        if targets is None:
            return self._logits_fwd(idx, self.emb_pad), None
        return self._loss_fwd(idx, targets, self.emb_pad, self.row_lse_pad)

    # TODO(synk): generate() needs a host-side autoregressive multinomial
    # sampling loop; not a kernel hot path, so it is omitted here.


def _reference_forward(embedding, idx, targets):
    """Pure-JAX reference mirroring the PyTorch semantics."""
    b, t = idx.shape
    v = embedding.shape[0]
    logits = embedding[idx]                             # (B, T, V)
    logits2d = logits.reshape(b * t, v)
    tgt = targets.reshape(b * t)
    logp = jax.nn.log_softmax(logits2d, axis=-1)
    loss = -jnp.mean(logp[jnp.arange(b * t), tgt])
    return logits2d, loss


if __name__ == "__main__":
    key = jax.random.PRNGKey(0)
    k_emb, k_idx, k_tgt = jax.random.split(key, 3)

    model = BigramModel(VOCAB_SIZE, k_emb)

    idx = jax.random.randint(k_idx, (BATCH_SIZE, BLOCK_SIZE), 0, VOCAB_SIZE,
                             dtype=jnp.int32)
    targets = jax.random.randint(k_tgt, (BATCH_SIZE, BLOCK_SIZE), 0, VOCAB_SIZE,
                                 dtype=jnp.int32)

    logits, loss = model.forward(idx, targets)
    logits = jax.block_until_ready(logits)
    loss = jax.block_until_ready(loss)

    # Sanity check against a pure-JAX reference (no printing unless it fails).
    ref_logits, ref_loss = _reference_forward(model.embedding, idx, targets)
    assert logits.shape == (BATCH_SIZE * BLOCK_SIZE, VOCAB_SIZE)
    assert jnp.allclose(logits, ref_logits, atol=1e-5, rtol=1e-5)
    assert jnp.allclose(loss, ref_loss, atol=1e-5, rtol=1e-5)

    # Also exercise the targets=None (inference) path.
    logits_no_tgt, loss_none = model.forward(idx, None)
    logits_no_tgt = jax.block_until_ready(logits_no_tgt)
    assert logits_no_tgt.shape == (BATCH_SIZE, BLOCK_SIZE, VOCAB_SIZE)
    assert loss_none is None
    assert jnp.allclose(logits_no_tgt.reshape(-1, VOCAB_SIZE), ref_logits,
                        atol=1e-5, rtol=1e-5)

    print("KERNEL_OK")
</pallas_src>

<mosaic_0001>
module attributes {stable_mosaic.version = 11 : i64} {
  func.func @bigram_loss_kernel(%arg0: i32, %arg1: memref<128x2xi32, #tpu.memory_space<vmem>>, %arg2: memref<128x128xf32, #tpu.memory_space<vmem>>, %arg3: memref<1x128xf32, #tpu.memory_space<vmem>>, %arg4: memref<128x128xf32, #tpu.memory_space<vmem>>, %arg5: memref<1x128xf32, #tpu.memory_space<vmem>>) attributes {dimension_semantics = [#tpu.dimension_semantics<parallel>], iteration_bounds = array<i64: 2>, scalar_prefetch = 0 : i64, scratch_operands = 0 : i64, tpu.core_type = #tpu.core_type<tc>, window_params = [{transform_indices = @transform_0, window_bounds = array<i64: 128, 2>}, {pipeline_mode = #tpu.pipeline_mode<synchronous>, transform_indices = @transform_1, window_bounds = array<i64: 128, 128>}, {pipeline_mode = #tpu.pipeline_mode<synchronous>, transform_indices = @transform_2, window_bounds = array<i64: 1, 128>}, {transform_indices = @transform_3, window_bounds = array<i64: 128, 128>}, {transform_indices = @transform_4, window_bounds = array<i64: 1, 128>}]} {
    %c0 = arith.constant 0 : index
    %c0_0 = arith.constant 0 : index
    %0 = vector.load %arg1[%c0, %c0_0] : memref<128x2xi32, #tpu.memory_space<vmem>>, vector<128x1xi32>
    %c0_1 = arith.constant 0 : index
    %c1 = arith.constant 1 : index
    %1 = vector.load %arg1[%c0_1, %c1] : memref<128x2xi32, #tpu.memory_space<vmem>>, vector<128x1xi32>
    %2 = tpu.iota {dimensions = array<i32: 1>} : vector<128x128xi32>
    %3 = vector.broadcast %0 : vector<128x1xi32> to vector<128x128xi32>
    %4 = arith.cmpi eq, %2, %3 : vector<128x128xi32>
    %5 = arith.extui %4 : vector<128x128xi1> to vector<128x128xi32>
    %6 = arith.sitofp %5 : vector<128x128xi32> to vector<128x128xf32>
    %c0_2 = arith.constant 0 : index
    %c0_3 = arith.constant 0 : index
    %7 = vector.load %arg2[%c0_2, %c0_3] : memref<128x128xf32, #tpu.memory_space<vmem>>, vector<128x128xf32>
    %cst = arith.constant dense<0.000000e+00> : vector<128x128xf32>
    %8 = tpu.matmul %6, %7, %cst {dimension_numbers = #tpu.dot_dimension_numbers<[1], [0], [0], [1], [0, 0, 1, 1], [], []>} : vector<128x128xf32>, vector<128x128xf32>, vector<128x128xf32> -> vector<128x128xf32>
    %c0_4 = arith.constant 0 : index
    %c0_5 = arith.constant 0 : index
    %9 = vector.load %arg4[%c0_4, %c0_5] : memref<128x128xf32, #tpu.memory_space<vmem>>, vector<128x128xf32>
    tpu.vector_store %arg4[%c0_4, %c0_5], %8 {strides = array<i32>} : memref<128x128xf32, #tpu.memory_space<vmem>>, vector<128x128xf32>,
    %c0_6 = arith.constant 0 : index
    %c0_7 = arith.constant 0 : index
    %10 = vector.load %arg3[%c0_6, %c0_7] : memref<1x128xf32, #tpu.memory_space<vmem>>, vector<1x128xf32>
    %11 = vector.shape_cast %10 : vector<1x128xf32> to vector<1x128xf32>
    %12 = vector.broadcast %11 : vector<1x128xf32> to vector<128x128xf32>
    %13 = vector.broadcast %0 : vector<128x1xi32> to vector<128x128xi32>
    %14 = arith.cmpi eq, %2, %13 : vector<128x128xi32>
    %cst_8 = arith.constant 0.000000e+00 : f32
    %15 = vector.broadcast %cst_8 : f32 to vector<128x128xf32>
    %16 = arith.select %14, %12, %15 : vector<128x128xi1>, vector<128x128xf32>
    %cst_9 = arith.constant dense<0.000000e+00> : vector<128xf32>
    %17 = vector.multi_reduction <add>, %16, %cst_9 [1] : vector<128x128xf32> to vector<128xf32>
    %18 = vector.shape_cast %17 : vector<128xf32> to vector<128x1xf32>
    %19 = vector.broadcast %1 : vector<128x1xi32> to vector<128x128xi32>
    %20 = arith.cmpi eq, %2, %19 : vector<128x128xi32>
    %cst_10 = arith.constant 0.000000e+00 : f32
    %21 = vector.broadcast %cst_10 : f32 to vector<128x128xf32>
    %22 = arith.select %20, %8, %21 : vector<128x128xi1>, vector<128x128xf32>
    %cst_11 = arith.constant dense<0.000000e+00> : vector<128xf32>
    %23 = vector.multi_reduction <add>, %22, %cst_11 [1] : vector<128x128xf32> to vector<128xf32>
    %24 = vector.shape_cast %23 : vector<128xf32> to vector<128x1xf32>
    %25 = arith.subf %18, %24 : vector<128x1xf32>
    %cst_12 = arith.constant dense<0.000000e+00> : vector<1xf32>
    %26 = vector.multi_reduction <add>, %25, %cst_12 [0] : vector<128x1xf32> to vector<1xf32>
    %27 = vector.shape_cast %26 : vector<1xf32> to vector<1x1xf32>
    %cst_13 = arith.constant 3.906250e-03 : f32
    %28 = vector.broadcast %cst_13 : f32 to vector<1x1xf32>
    %29 = arith.mulf %27, %28 : vector<1x1xf32>
    %30 = vector.shape_cast %29 : vector<1x1xf32> to vector<1x1xf32>
    %31 = vector.broadcast %30 : vector<1x1xf32> to vector<1x128xf32>
    %c0_14 = arith.constant 0 : index
    %c0_15 = arith.constant 0 : index
    %32 = vector.load %arg5[%c0_14, %c0_15] : memref<1x128xf32, #tpu.memory_space<vmem>>, vector<1x128xf32>
    tpu.vector_store %arg5[%c0_14, %c0_15], %31 {strides = array<i32>} : memref<1x128xf32, #tpu.memory_space<vmem>>, vector<1x128xf32>,
    return
  }
  func.func @transform_0(%arg0: i32) -> (i32, i32) {
    %c0_i32 = arith.constant 0 : i32
    %c0_i32_0 = arith.constant 0 : i32
    return %arg0, %c0_i32 : i32, i32
  }
  func.func @transform_1(%arg0: i32) -> (i32, i32) {
    %c0_i32 = arith.constant 0 : i32
    %c0_i32_0 = arith.constant 0 : i32
    %c0_i32_1 = arith.constant 0 : i32
    return %c0_i32, %c0_i32_0 : i32, i32
  }
  func.func @transform_2(%arg0: i32) -> (i32, i32) {
    %c0_i32 = arith.constant 0 : i32
    %c0_i32_0 = arith.constant 0 : i32
    %c0_i32_1 = arith.constant 0 : i32
    return %c0_i32, %c0_i32_0 : i32, i32
  }
  func.func @transform_3(%arg0: i32) -> (i32, i32) {
    %c0_i32 = arith.constant 0 : i32
    %c0_i32_0 = arith.constant 0 : i32
    return %arg0, %c0_i32 : i32, i32
  }
  func.func @transform_4(%arg0: i32) -> (i32, i32) {
    %c0_i32 = arith.constant 0 : i32
    %c0_i32_0 = arith.constant 0 : i32
    return %c0_i32, %arg0 : i32, i32
  }
}

</mosaic_0001>

<bundles_post_ra>
// kernel: _loss_forward.1
= control target key start
LH: loop header
LB: loop body
LE: loop exit
PB: predicated region body
PF: predicated region fallthrough
CT: control target
= control target key end

     0   :  { %s850_s15 = smov 0   ;;  %s1201_s0 = inlined_call_operand.vmem [shape: s32[256,2], index: 0, kind: input, shape index: {}]   ;;  %s1202_s1 = inlined_call_operand.vmem [shape: f32[128,128], index: 1, kind: input, shape index: {}]   ;;  %s1203_s2 = inlined_call_operand.vmem [shape: f32[1,128], index: 2, kind: input, shape index: {}]   ;;  %s1204_s3 = inlined_call_operand.vmem [shape: f32[256,128], index: 3, kind: output, shape index: {0}]   ;;  %s1205_s4 = inlined_call_operand.vmem [shape: f32[1,256], index: 4, kind: output, shape index: {1}]  }
   0x1 LB: > { %s856_s16 = sadd.s32 4294967295, %s820_s15   ;;  %p709_p0 = scmp.ge.s32.totalorder %s820_s15, 1  ;;  %s820_s15 = sphi %s850_s15, %s15_s15  }
   0x2   : > { %p166_p1 = scmp.lt.s32.totalorder %s820_s15, 3 }
   0x4   : > { %p167_p2 = pnand %p709_p0, %p166_p1 }
   0x5   : > { %s710_s17 = sshll.u32 (!%p167_p2), %s856_s16, 4  ;;  %p207_p4 = scmp.lt.s32.totalorder (!%p167_p2), %s856_s16, 1 }
   0x6   : > { %170 = sbr.rel (%p167_p2) target bundleno = 492 (0x1ec), region = 32  ;;  %p196_p3 = scmp.lt.s32.totalorder (!%p167_p2), %s710_s17, 31 }
   0xb   : > { %v822_v0 = vmov 0   ;;  %s1207_s17 = smov (!%p196_p3, %s710_s17), 31  ;;  %v339_v7 = vld [vmem:[%s1202_s1 + $0x78] sm:$0xff]  ;;  %v338_v8 = vld [vmem:[%s1202_s1 + $0x70] sm:$0xff]  ;;  %v337_v9 = vld [vmem:[%s1202_s1 + $0x68] sm:$0xff]  ;;  %v226_v32 = vlaneseq  ;;  %v823_v36 = vmov 1.0  }
   0xc   : > { %809 = vset.pattern.permute.xlu2 %v822_v0  ;;  %808 = vset.pattern.permute.xlu1 %v822_v0  ;;  %s711_s18 = sshll.u32 %s1207_s17, 3  ;;  %v336_v20 = vld [vmem:[%s1202_s1 + $0x60] sm:$0xff]  ;;  %v335_v21 = vld [vmem:[%s1202_s1 + $0x58] sm:$0xff]  ;;  %v334_v22 = vld [vmem:[%s1202_s1 + $0x50] sm:$0xff]  ;;  %v824_v54 = vmov 1   ;;  %s1209_s16 = smov (!%p207_p4, %s856_s16), 1 }
   0xd   : > { %807 = vset.pattern.permute.xlu0 %v822_v0  ;;  %s869_s21 = scalar_lea.vmem %s1201_s0, %s711_s18  ;;  %340 = vmatpush.msra.mxu0 %v339_v7  ;;  %v333_v23 = vld [vmem:[%s1202_s1 + $0x48] sm:$0xff]  ;;  %v332_v24 = vld [vmem:[%s1202_s1 + $0x40] sm:$0xff]  ;;  %v331_v25 = vld [vmem:[%s1202_s1 + $0x38] sm:$0xff]  ;;  %v983_v34 = vand.u32 127, %v226_v32  ;;  %s1089_s10 = scalar_lea.vmem %s1204_s3, %s711_s18 }
   0xe   : > { %v872_v1 = vld [vmem:[%s869_s21 + $0x20] sm:$0xff]  ;;  %v875_v2 = vld [vmem:[%s869_s21 + $0x10] sm:$0xff]  ;;  %v884_v4 = vld [vmem:[%s869_s21 + $0x28] sm:$0xff]  ;;  %748 = vmatpush.msra.mxu1 %v339_v7  ;;  %749 = vmatpush.msra.mxu2 %v339_v7  ;;  %s209_s11 = scalar_lea.vmem %s1205_s4, %s1209_s16 }
   0xf   : > { %v878_v3 = vld [vmem:[%s869_s21] sm:$0xff]  ;;  %241 = vperm.xlu2 %809, %v872_v1   ;;  %235 = vperm.xlu1 %808, %v875_v2   ;;  %v887_v5 = vld [vmem:[%s869_s21 + $0x18] sm:$0xff]  ;;  %v890_v6 = vld [vmem:[%s869_s21 + $0x8] sm:$0xff] }
  0x10   : > { %229 = vperm.xlu0 %807, %v878_v3   ;;  %750 = vmatpush.msra.mxu3 %v339_v7  ;;  %v905_v10 = vld [vmem:[%s869_s21 + $0x40] sm:$0xff]  ;;  %v908_v11 = vld [vmem:[%s869_s21 + $0x38] sm:$0xff]  ;;  %v911_v12 = vld [vmem:[%s869_s21 + $0x30] sm:$0xff] }
  0x11   : > { %341 = vmatpush.msra.mxu0 %v338_v8  ;;  %751 = vmatpush.msra.mxu1 %v338_v8  ;;  %v917_v13 = vld [vmem:[%s869_s21 + $0x60] sm:$0xff]  ;;  %v920_v14 = vld [vmem:[%s869_s21 + $0x50] sm:$0xff]  ;;  %v923_v15 = vld [vmem:[%s869_s21 + $0x48] sm:$0xff] }
  0x12   : > { %752 = vmatpush.msra.mxu2 %v338_v8  ;;  %753 = vmatpush.msra.mxu3 %v338_v8  ;;  %v929_v16 = vld [vmem:[%s869_s21 + $0x70] sm:$0xff]  ;;  %v932_v17 = vld [vmem:[%s869_s21 + $0x58] sm:$0xff]  ;;  %v935_v18 = vld [vmem:[%s869_s21 + $0x68] sm:$0xff] }
  0x13   : > { %342 = vmatpush.msra.mxu0 %v337_v9  ;;  %754 = vmatpush.msra.mxu1 %v337_v9  ;;  %v941_v19 = vld [vmem:[%s869_s21 + $0x78] sm:$0xff]  ;;  %v330_v26 = vld [vmem:[%s1202_s1 + $0x30] sm:$0xff]  ;;  %v329_v27 = vld [vmem:[%s1202_s1 + $0x28] sm:$0xff] }
  0x14   : > { %755 = vmatpush.msra.mxu2 %v337_v9  ;;  %756 = vmatpush.msra.mxu3 %v337_v9  ;;  %v328_v28 = vld [vmem:[%s1202_s1 + $0x20] sm:$0xff]  ;;  %v327_v29 = vld [vmem:[%s1202_s1 + $0x18] sm:$0xff]  ;;  %v326_v30 = vld [vmem:[%s1202_s1 + $0x10] sm:$0xff] }
  0x15   : > { %343 = vmatpush.msra.mxu0 %v336_v20  ;;  %757 = vmatpush.msra.mxu1 %v336_v20  ;;  %v325_v31 = vld [vmem:[%s1202_s1 + $0x8] sm:$0xff]  ;;  %v324_v33 = vld [vmem:[%s1202_s1] sm:$0xff] }
  0x16   : > { %758 = vmatpush.msra.mxu2 %v336_v20  ;;  %759 = vmatpush.msra.mxu3 %v336_v20  ;;  %v1000_v39 = vld [vmem:[%s1203_s2] ss:$0 sm:$0xff] }
  0x17   : > { %244 = vperm.xlu2 %809, %v884_v4   ;;  %238 = vperm.xlu1 %808, %v887_v5  }
  0x18   : > { %232 = vperm.xlu0 %807, %v890_v6   ;;  %344 = vmatpush.msra.mxu0 %v335_v21 }
  0x19   : > { %760 = vmatpush.msra.mxu1 %v335_v21  ;;  %761 = vmatpush.msra.mxu2 %v335_v21 }
  0x1a   : > { %762 = vmatpush.msra.mxu3 %v335_v21  ;;  %345 = vmatpush.msra.mxu0 %v334_v22 }
  0x1b   : > { %763 = vmatpush.msra.mxu1 %v334_v22  ;;  %764 = vmatpush.msra.mxu2 %v334_v22 }
  0x1c   : > { %765 = vmatpush.msra.mxu3 %v334_v22  ;;  %346 = vmatpush.msra.mxu0 %v333_v23 }
  0x1d   : > { %766 = vmatpush.msra.mxu1 %v333_v23  ;;  %767 = vmatpush.msra.mxu2 %v333_v23 }
  0x1e   : > { %768 = vmatpush.msra.mxu3 %v333_v23  ;;  %347 = vmatpush.msra.mxu0 %v332_v24 }
  0x1f   : > { %253 = vperm.xlu2 %809, %v905_v10   ;;  %250 = vperm.xlu1 %808, %v908_v11  }
  0x20   : > { %247 = vperm.xlu0 %807, %v911_v12   ;;  %769 = vmatpush.msra.mxu1 %v332_v24 }
  0x21   : > { %770 = vmatpush.msra.mxu2 %v332_v24  ;;  %771 = vmatpush.msra.mxu3 %v332_v24 }
  0x22   : > { %348 = vmatpush.msra.mxu0 %v331_v25  ;;  %772 = vmatpush.msra.mxu1 %v331_v25 }
  0x23   : > { %773 = vmatpush.msra.mxu2 %v331_v25  ;;  %774 = vmatpush.msra.mxu3 %v331_v25 }
  0x24   : > { %349 = vmatpush.msra.mxu0 %v330_v26  ;;  %775 = vmatpush.msra.mxu1 %v330_v26 }
  0x25   : > { %776 = vmatpush.msra.mxu2 %v330_v26  ;;  %777 = vmatpush.msra.mxu3 %v330_v26 }
  0x26   : > { %350 = vmatpush.msra.mxu0 %v329_v27  ;;  %778 = vmatpush.msra.mxu1 %v329_v27 }
  0x27   : > { %265 = vperm.xlu2 %809, %v917_v13   ;;  %259 = vperm.xlu1 %808, %v920_v14  }
  0x28   : > { %256 = vperm.xlu0 %807, %v923_v15   ;;  %779 = vmatpush.msra.mxu2 %v329_v27 }
  0x29   : > { %780 = vmatpush.msra.mxu3 %v329_v27  ;;  %351 = vmatpush.msra.mxu0 %v328_v28 }
  0x2a   : > { %781 = vmatpush.msra.mxu1 %v328_v28  ;;  %782 = vmatpush.msra.mxu2 %v328_v28 }
  0x2b   : > { %783 = vmatpush.msra.mxu3 %v328_v28  ;;  %352 = vmatpush.msra.mxu0 %v327_v29 }
  0x2c   : > { %784 = vmatpush.msra.mxu1 %v327_v29  ;;  %785 = vmatpush.msra.mxu2 %v327_v29 }
  0x2d   : > { %786 = vmatpush.msra.mxu3 %v327_v29  ;;  %353 = vmatpush.msra.mxu0 %v326_v30 }
  0x2e   : > { %787 = vmatpush.msra.mxu1 %v326_v30  ;;  %788 = vmatpush.msra.mxu2 %v326_v30 }
  0x2f   : > { %271 = vperm.xlu2 %809, %v929_v16   ;;  %262 = vperm.xlu1 %808, %v932_v17  }
  0x30   : > { %268 = vperm.xlu0 %807, %v935_v18   ;;  %789 = vmatpush.msra.mxu3 %v326_v30 }
  0x31   : > { %354 = vmatpush.msra.mxu0 %v325_v31  ;;  %790 = vmatpush.msra.mxu1 %v325_v31 }
  0x32   : > { %791 = vmatpush.msra.mxu2 %v325_v31  ;;  %792 = vmatpush.msra.mxu3 %v325_v31 }
  0x33   : > { %355 = vmatpush.msra.mxu0 %v324_v33  ;;  %793 = vmatpush.msra.mxu1 %v324_v33 }
  0x34   : > { %794 = vmatpush.msra.mxu2 %v324_v33  ;;  %795 = vmatpush.msra.mxu3 %v324_v33 }
  0x37   : > { %810 = vset.pattern.permute.xlu1 %v824_v54  ;;  %811 = vset.pattern.permute.xlu2 %v824_v54 }
  0x38   : > { %274 = vperm.xlu0 %807, %v941_v19  }
  0x40   : > { %812 = vset.pattern.permute.xlu0 %v824_v54 }
  0x69   : > { %v242_v35 = vpop.permute.xlu2 %241 }
  0x6a   : > { %vm280_vm0 = vcmp.eq.s32.totalorder %v983_v34, %v242_v35 }
  0x6b   : > { %734 = vmatmul.msk.f32.vlgmr.msra.gmra.mxu1 %vm280_vm0, %v823_v36  ;;  %v429_v47 = vsel %vm280_vm0, %v1000_v39, 0.0 }
  0x71   : > { %v245_v37 = vpop.permute.xlu2 %244 }
  0x72   : > { %vm281_vm1 = vcmp.eq.s32.totalorder %v983_v34, %v245_v37 }
  0x73   : > { %735 = vmatmul.msk.f32.gmra.mxu1 %vm281_vm1, %v823_v36  ;;  %v430_v59 = vsel %vm281_vm1, %v1000_v39, 0.0 }
  0x79   : > { %v254_v38 = vpop.permute.xlu2 %253 }
  0x7a   : > { %vm284_vm2 = vcmp.eq.s32.totalorder %v983_v34, %v254_v38 }
  0x7b   : > { %738 = vmatmul.msk.f32.vlgmr.msra.gmra.mxu2 %vm284_vm2, %v823_v36  ;;  %v433_v62 = vsel %vm284_vm2, %v1000_v39, 0.0 }
  0x81   : > { %v266_v40 = vpop.permute.xlu2 %265  ;;  %v236_v41 = vpop.permute.xlu1 %235 }
  0x82   : > { %vm288_vm3 = vcmp.eq.s32.totalorder %v983_v34, %v266_v40  ;;  %vm278_vm4 = vcmp.eq.s32.totalorder %v983_v34, %v236_v41  ;;  %v230_v42 = vpop.permute.xlu0 %229 }
  0x83   : > { %vm276_vm5 = vcmp.eq.s32.totalorder %v983_v34, %v230_v42  ;;  %v427_v43 = vsel %vm278_vm4, %v1000_v39, 0.0  ;;  %742 = vmatmul.msk.f32.vlgmr.msra.gmra.mxu3 %vm288_vm3, %v823_v36  ;;  %v437_v63 = vsel %vm288_vm3, %v1000_v39, 0.0 }
  0x84   : > { %730 = vmatmul.msk.f32.vlgmr.msra.gmra.mxu0 %vm276_vm5, %v823_v36  ;;  %445 = vadd.xlane.f32.xlu0 %v427_v43  ;;  %v425_v44 = vsel %vm276_vm5, %v1000_v39, 0.0 }
  0x85   : > { %441 = vadd.xlane.f32.xlu1 %v425_v44 }
  0x89   : > { %v239_v45 = vpop.permute.xlu1 %238  ;;  %v272_v7 = vpop.permute.xlu2 %271 }
  0x8a   : > { %v233_v46 = vpop.permute.xlu0 %232  ;;  %vm279_vm7 = vcmp.eq.s32.totalorder %v983_v34, %v239_v45  ;;  %vm290_vm14 = vcmp.eq.s32.totalorder %v983_v34, %v272_v7 }
  0x8b   : > { %vm277_vm6 = vcmp.eq.s32.totalorder %v983_v34, %v233_v46  ;;  %v428_v52 = vsel %vm279_vm7, %v1000_v39, 0.0  ;;  %v439_v21 = vsel %vm290_vm14, %v1000_v39, 0.0 }
  0x8c   : > { %731 = vmatmul.msk.f32.gmra.mxu0 %vm277_vm6, %v823_v36  ;;  %v426_v48 = vsel %vm277_vm6, %v1000_v39, 0.0 }
  0x8d   : > { %449 = vadd.xlane.f32.xlu1 %v429_v47  ;;  %443 = vadd.xlane.f32.xlu2 %v426_v48 }
  0x91   : > { %v251_v49 = vpop.permute.xlu1 %250 }
  0x92   : > { %vm283_vm8 = vcmp.eq.s32.totalorder %v983_v34, %v251_v49  ;;  %v248_v50 = vpop.permute.xlu0 %247 }
  0x93   : > { %vm282_vm9 = vcmp.eq.s32.totalorder %v983_v34, %v248_v50  ;;  %v432_v51 = vsel %vm283_vm8, %v1000_v39, 0.0 }
  0x94   : > { %732 = vmatmul.msk.f32.gmra.mxu0 %vm278_vm4, %v823_v36  ;;  %736 = vmatmul.msk.f32.gmra.mxu1 %vm282_vm9, %v823_v36  ;;  %v431_v53 = vsel %vm282_vm9, %v1000_v39, 0.0 }
  0x95   : > { %455 = vadd.xlane.f32.xlu1 %v432_v51  ;;  %447 = vadd.xlane.f32.xlu2 %v428_v52 }
  0x96   : > { %453 = vadd.xlane.f32.xlu0 %v431_v53 }
  0x99   : > { %v260_v55 = vpop.permute.xlu1 %259 }
  0x9a   : > { %vm286_vm10 = vcmp.eq.s32.totalorder %v983_v34, %v260_v55  ;;  %v257_v56 = vpop.permute.xlu0 %256 }
  0x9b   : > { %vm285_vm11 = vcmp.eq.s32.totalorder %v983_v34, %v257_v56  ;;  %v435_v57 = vsel %vm286_vm10, %v1000_v39, 0.0 }
  0x9c   : > { %733 = vmatmul.msk.f32.gmra.mxu0 %vm279_vm7, %v823_v36  ;;  %737 = vmatmul.msk.f32.gmra.mxu1 %vm283_vm8, %v823_v36  ;;  %v434_v58 = vsel %vm285_vm11, %v1000_v39, 0.0 }
  0x9d   : > { %739 = vmatmul.msk.f32.gmra.mxu2 %vm285_vm11, %v823_v36  ;;  %461 = vadd.xlane.f32.xlu1 %v435_v57 }
  0x9e   : > { %451 = vadd.xlane.f32.xlu2 %v430_v59  ;;  %459 = vadd.xlane.f32.xlu0 %v434_v58 }
  0xa1   : > { %v263_v0 = vpop.permute.xlu1 %262 }
  0xa2   : > { %v269_v60 = vpop.permute.xlu0 %268  ;;  %vm287_vm13 = vcmp.eq.s32.totalorder %v983_v34, %v263_v0 }
  0xa3   : > { %vm289_vm12 = vcmp.eq.s32.totalorder %v983_v34, %v269_v60  ;;  %v436_v20 = vsel %vm287_vm13, %v1000_v39, 0.0 }
  0xa4   : > { %743 = vmatmul.msk.f32.gmra.mxu3 %vm289_vm12, %v823_v36  ;;  %v438_v61 = vsel %vm289_vm12, %v1000_v39, 0.0 }
  0xa5   : > { %740 = vmatmul.msk.f32.gmra.mxu2 %vm286_vm10, %v823_v36  ;;  %467 = vadd.xlane.f32.xlu1 %v438_v61 }
  0xa6   : > { %457 = vadd.xlane.f32.xlu2 %v433_v62  ;;  %465 = vadd.xlane.f32.xlu0 %v437_v63 }
  0xaa   : > { %v275_v8 = vpop.permute.xlu0 %274 }
  0xab   : > { %vm291_vm15 = vcmp.eq.s32.totalorder %v983_v34, %v275_v8 }
  0xac   : > { %744 = vmatmul.msk.f32.gmra.mxu3 %vm290_vm14, %v823_v36  ;;  %v440_v9 = vsel %vm291_vm15, %v1000_v39, 0.0 }
  0xad   : > { %741 = vmatmul.msk.f32.gmra.mxu2 %vm287_vm13, %v823_v36 }
  0xae   : > { %463 = vadd.xlane.f32.xlu2 %v436_v20  ;;  %471 = vadd.xlane.f32.xlu0 %v440_v9 }
  0xb4   : > { %745 = vmatmul.msk.f32.gmra.mxu3 %vm291_vm15, %v823_v36 }
  0xb6   : > { %469 = vadd.xlane.f32.xlu2 %v439_v21 }
  0xbe   : > { %474 = vperm.xlu1 %810, %v878_v3  }
  0xc2   : > { %480 = vperm.xlu0 %812, %v875_v2  }
  0xc6   : > { %483 = vperm.xlu1 %810, %v887_v5  }
  0xca   : > { %501 = vperm.xlu0 %812, %v923_v15  }
  0xce   : > { %477 = vperm.xlu2 %811, %v890_v6   ;;  %489 = vperm.xlu1 %810, %v884_v4  }
  0xd2   : > { %510 = vperm.xlu0 %812, %v917_v13  }
  0xd6   : > { %486 = vperm.xlu2 %811, %v872_v1   ;;  %495 = vperm.xlu1 %810, %v908_v11  }
  0xda   : > { %519 = vperm.xlu0 %812, %v941_v19  }
  0xde   : > { %492 = vperm.xlu2 %811, %v911_v12   ;;  %504 = vperm.xlu1 %810, %v920_v14  }
  0xe6   : > { %498 = vperm.xlu2 %811, %v905_v10   ;;  %513 = vperm.xlu1 %810, %v935_v18  }
  0xe8   : > { %v369_v1 = vpop.f32.mrf.mxu1 }
  0xe9   : > { %409 = vst [vmem:[%s1089_s10 + $0x20] sm:$0xff] %v369_v1 }
  0xee   : > { %507 = vperm.xlu2 %811, %v932_v17  }
  0xf0   : > { %v1093_v2 = vpop.f32.mrf.mxu1 }
  0xf1   : > { %410 = vst [vmem:[%s1089_s10 + $0x28] sm:$0xff] %v1093_v2 }
  0xf6   : > { %516 = vperm.xlu2 %811, %v929_v16  }
  0xf7   : > { %v1116_v14 = vpop.xlane.xlu0 %445 }
  0xf8   : > { %v1102_v4 = vpop.xlane.xlu1 %441 }
  0xfe   : > { %v1098_v3 = vpop.f32.mrf.mxu2 }
  0xff   : > { %413 = vst [vmem:[%s1089_s10 + $0x40] sm:$0xff] %v1098_v3 }
 0x100   : > { %v1104_v5 = vpop.xlane.xlu2 %443  ;;  %v1113_v13 = vpop.xlane.xlu1 %449 }
 0x101   : > { %v357_v6 = vpop.f32.mrf.mxu0 }
 0x102   : > { %405 = vst [vmem:[%s1089_s10] sm:$0xff] %v357_v6 }
 0x106   : > { %v1107_v10 = vpop.f32.mrf.mxu3 }
 0x107   : > { %417 = vst [vmem:[%s1089_s10 + $0x60] sm:$0xff] %v1107_v10 }
 0x108   : > { %v1111_v11 = vpop.xlane.xlu2 %447  ;;  %v1121_v18 = vpop.xlane.xlu1 %455 }
 0x109   : > { %v360_v12 = vpop.f32.mrf.mxu0  ;;  %v1124_v19 = vpop.xlane.xlu0 %453 }
 0x10a   : > { %406 = vst [vmem:[%s1089_s10 + $0x8] sm:$0xff] %v360_v12 }
 0x110   : > { %v1130_v25 = vpop.xlane.xlu1 %461 }
 0x111   : > { %v1118_v15 = vpop.xlane.xlu2 %451  ;;  %v363_v16 = vpop.f32.mrf.mxu0 }
 0x112   : > { %v375_v17 = vpop.f32.mrf.mxu1  ;;  %407 = vst [vmem:[%s1089_s10 + $0x10] sm:$0xff] %v363_v16  ;;  %v1135_v28 = vpop.xlane.xlu0 %459 }
 0x113   : > { %411 = vst [vmem:[%s1089_s10 + $0x30] sm:$0xff] %v375_v17 }
 0x118   : > { %v1139_v30 = vpop.xlane.xlu1 %467 }
 0x119   : > { %v1126_v22 = vpop.xlane.xlu2 %457  ;;  %v366_v23 = vpop.f32.mrf.mxu0 }
 0x11a   : > { %v378_v24 = vpop.f32.mrf.mxu1  ;;  %408 = vst [vmem:[%s1089_s10 + $0x18] sm:$0xff] %v366_v23  ;;  %v1146_v33 = vpop.xlane.xlu0 %465 }
 0x11b   : > { %412 = vst [vmem:[%s1089_s10 + $0x38] sm:$0xff] %v378_v24 }
 0x120   : > { %v384_v26 = vpop.f32.mrf.mxu2 }
 0x121   : > { %414 = vst [vmem:[%s1089_s10 + $0x48] sm:$0xff] %v384_v26  ;;  %v1133_v27 = vpop.xlane.xlu2 %463 }
 0x122   : > { %v1154_v40 = vpop.xlane.xlu0 %471 }
 0x127   : > { %v1137_v29 = vpop.f32.mrf.mxu3 }
 0x128   : > { %v387_v31 = vpop.f32.mrf.mxu2  ;;  %418 = vst [vmem:[%s1089_s10 + $0x68] sm:$0xff] %v1137_v29 }
 0x129   : > { %415 = vst [vmem:[%s1089_s10 + $0x50] sm:$0xff] %v387_v31  ;;  %v1144_v32 = vpop.xlane.xlu2 %469 }
 0x12f   : > { %v1148_v35 = vpop.f32.mrf.mxu3 }
 0x130   : > { %v390_v36 = vpop.f32.mrf.mxu2  ;;  %419 = vst [vmem:[%s1089_s10 + $0x70] sm:$0xff] %v1148_v35  ;;  %v475_v37 = vpop.permute.xlu1 %474 }
 0x131   : > { %416 = vst [vmem:[%s1089_s10 + $0x58] sm:$0xff] %v390_v36  ;;  %v478_v38 = vpop.permute.xlu2 %477  ;;  %vm521_vm0 = vcmp.eq.s32.totalorder %v983_v34, %v475_v37 }
 0x132   : > { %v537_v39 = vsel %vm521_vm0, %v357_v6, 0.0  ;;  %vm522_vm2 = vcmp.eq.s32.totalorder %v983_v34, %v478_v38 }
 0x133   : > { %553 = vadd.xlane.f32.xlu1 %v537_v39  ;;  %v538_v49 = vsel %vm522_vm2, %v360_v12, 0.0 }
 0x134   : > { %v481_v45 = vpop.permute.xlu0 %480 }
 0x135   : > { %vm523_vm5 = vcmp.eq.s32.totalorder %v983_v34, %v481_v45 }
 0x136   : > { %v539_v55 = vsel %vm523_vm5, %v363_v16, 0.0 }
 0x137   : > { %v402_v41 = vpop.f32.mrf.mxu3 }
 0x138   : > { %420 = vst [vmem:[%s1089_s10 + $0x78] sm:$0xff] %v402_v41  ;;  %v484_v42 = vpop.permute.xlu1 %483 }
 0x139   : > { %v487_v43 = vpop.permute.xlu2 %486  ;;  %vm524_vm6 = vcmp.eq.s32.totalorder %v983_v34, %v484_v42 }
 0x13a   : > { %vm525_vm1 = vcmp.eq.s32.totalorder %v983_v34, %v487_v43  ;;  %v540_v56 = vsel %vm524_vm6, %v366_v23, 0.0 }
 0x13b   : > { %v541_v44 = vsel %vm525_vm1, %v369_v1, 0.0 }
 0x13c   : > { %561 = vadd.xlane.f32.xlu2 %v541_v44  ;;  %v502_v52 = vpop.permute.xlu0 %501 }
 0x13d   : > { %vm530_vm9 = vcmp.eq.s32.totalorder %v983_v34, %v502_v52 }
 0x13e   : > { %v546_v62 = vsel %vm530_vm9, %v384_v26, 0.0 }
 0x140   : > { %v490_v46 = vpop.permute.xlu1 %489 }
 0x141   : > { %v493_v47 = vpop.permute.xlu2 %492  ;;  %vm526_vm3 = vcmp.eq.s32.totalorder %v983_v34, %v490_v46 }
 0x142   : > { %vm527_vm4 = vcmp.eq.s32.totalorder %v983_v34, %v493_v47  ;;  %v542_v48 = vsel %vm526_vm3, %v1093_v2, 0.0 }
 0x143   : > { %v543_v50 = vsel %vm527_vm4, %v375_v17, 0.0  ;;  %563 = vadd.xlane.f32.xlu0 %v542_v48 }
 0x144   : > { %555 = vadd.xlane.f32.xlu2 %v538_v49  ;;  %565 = vadd.xlane.f32.xlu1 %v543_v50  ;;  %v511_v61 = vpop.permute.xlu0 %510 }
 0x145   : > { %vm533_vm12 = vcmp.eq.s32.totalorder %v983_v34, %v511_v61 }
 0x146   : > { %v549_v8 = vsel %vm533_vm12, %v1107_v10, 0.0 }
 0x148   : > { %v496_v51 = vpop.permute.xlu1 %495 }
 0x149   : > { %v499_v53 = vpop.permute.xlu2 %498  ;;  %vm528_vm7 = vcmp.eq.s32.totalorder %v983_v34, %v496_v51 }
 0x14a   : > { %v544_v54 = vsel %vm528_vm7, %v378_v24, 0.0  ;;  %vm529_vm8 = vcmp.eq.s32.totalorder %v983_v34, %v499_v53 }
 0x14b   : > { %557 = vadd.xlane.f32.xlu0 %v539_v55  ;;  %v545_v60 = vsel %vm529_vm8, %v1098_v3, 0.0 }
 0x14c   : > { %559 = vadd.xlane.f32.xlu1 %v540_v56  ;;  %567 = vadd.xlane.f32.xlu2 %v544_v54  ;;  %v520_v20 = vpop.permute.xlu0 %519 }
 0x14d   : > { %vm536_vm15 = vcmp.eq.s32.totalorder %v983_v34, %v520_v20 }
 0x14e   : > { %v552_v1 = vsel %vm536_vm15, %v402_v41, 0.0 }
 0x150   : > { %v505_v57 = vpop.permute.xlu1 %504 }
 0x151   : > { %vm531_vm10 = vcmp.eq.s32.totalorder %v983_v34, %v505_v57  ;;  %v508_v58 = vpop.permute.xlu2 %507 }
 0x152   : > { %v547_v59 = vsel %vm531_vm10, %v387_v31, 0.0  ;;  %vm532_vm11 = vcmp.eq.s32.totalorder %v983_v34, %v508_v58 }
 0x153   : > { %569 = vadd.xlane.f32.xlu0 %v545_v60  ;;  %v548_v7 = vsel %vm532_vm11, %v390_v36, 0.0 }
 0x154   : > { %573 = vadd.xlane.f32.xlu2 %v547_v59  ;;  %571 = vadd.xlane.f32.xlu1 %v546_v62 }
 0x158   : > { %v514_v63 = vpop.permute.xlu1 %513 }
 0x159   : > { %vm534_vm13 = vcmp.eq.s32.totalorder %v983_v34, %v514_v63  ;;  %v517_v9 = vpop.permute.xlu2 %516 }
 0x15a   : > { %v550_v0 = vsel %vm534_vm13, %v1137_v29, 0.0  ;;  %vm535_vm14 = vcmp.eq.s32.totalorder %v983_v34, %v517_v9 }
 0x15b   : > { %575 = vadd.xlane.f32.xlu0 %v548_v7  ;;  %v551_v21 = vsel %vm535_vm14, %v1148_v35, 0.0 }
 0x15c   : > { %579 = vadd.xlane.f32.xlu2 %v550_v0  ;;  %577 = vadd.xlane.f32.xlu1 %v549_v8 }
 0x163   : > { %581 = vadd.xlane.f32.xlu0 %v551_v21 }
 0x164   : > { %583 = vadd.xlane.f32.xlu1 %v552_v1 }
 0x1a6   : > { %v554_v2 = vpop.xlane.xlu1 %553 }
 0x1a7   : > { %v585_v17 = vsub.f32 %v1102_v4, %v554_v2 }
 0x1af   : > { %v562_v3 = vpop.xlane.xlu2 %561 }
 0x1b0   : > { %v589_v36 = vsub.f32 %v1113_v13, %v562_v3 }
 0x1b6   : > { %v564_v6 = vpop.xlane.xlu0 %563 }
 0x1b7   : > { %v556_v12 = vpop.xlane.xlu2 %555  ;;  %v566_v16 = vpop.xlane.xlu1 %565  ;;  %v590_v38 = vsub.f32 %v1118_v15, %v564_v6 }
 0x1b8   : > { %v586_v10 = vsub.f32 %v1104_v5, %v556_v12  ;;  %v591_v5 = vsub.f32 %v1124_v19, %v566_v16 }
 0x1ba   : > { %v601_v24 = vadd.f32 %v586_v10, %v585_v17 }
 0x1be   : > { %v558_v23 = vpop.xlane.xlu0 %557 }
 0x1bf   : > { %v568_v26 = vpop.xlane.xlu2 %567  ;;  %v560_v29 = vpop.xlane.xlu1 %559  ;;  %v587_v34 = vsub.f32 %v1116_v14, %v558_v23 }
 0x1c0   : > { %v588_v31 = vsub.f32 %v1111_v11, %v560_v29  ;;  %v592_v44 = vsub.f32 %v1121_v18, %v568_v26 }
 0x1c1   : > { %v602_v35 = vadd.f32 %v601_v24, %v587_v34 }
 0x1c3   : > { %v603_v37 = vadd.f32 %v602_v35, %v588_v31 }
 0x1c5   : > { %v604_v39 = vadd.f32 %v603_v37, %v589_v36 }
 0x1c6   : > { %v570_v41 = vpop.xlane.xlu0 %569 }
 0x1c7   : > { %v572_v42 = vpop.xlane.xlu1 %571  ;;  %v605_v4 = vadd.f32 %v604_v39, %v590_v38  ;;  %v574_v43 = vpop.xlane.xlu2 %573  ;;  %v593_v14 = vsub.f32 %v1126_v22, %v570_v41 }
 0x1c8   : > { %v594_v11 = vsub.f32 %v1135_v28, %v572_v42  ;;  %v595_v48 = vsub.f32 %v1130_v25, %v574_v43 }
 0x1c9   : > { %v606_v45 = vadd.f32 %v605_v4, %v591_v5 }
 0x1cb   : > { %v607_v46 = vadd.f32 %v606_v45, %v592_v44 }
 0x1cd   : > { %v608_v47 = vadd.f32 %v607_v46, %v593_v14 }
 0x1ce   : > { %v576_v13 = vpop.xlane.xlu0 %575 }
 0x1cf   : > { %v609_v15 = vadd.f32 %v608_v47, %v594_v11  ;;  %v578_v49 = vpop.xlane.xlu1 %577  ;;  %v596_v19 = vsub.f32 %v1133_v27, %v576_v13  ;;  %v580_v51 = vpop.xlane.xlu2 %579 }
 0x1d0   : > { %v597_v52 = vsub.f32 %v1146_v33, %v578_v49  ;;  %v598_v53 = vsub.f32 %v1139_v30, %v580_v51 }
 0x1d1   : > { %v610_v50 = vadd.f32 %v609_v15, %v595_v48 }
 0x1d3   : > { %v611_v18 = vadd.f32 %v610_v50, %v596_v19 }
 0x1d5   : > { %v612_v22 = vadd.f32 %v611_v18, %v597_v52 }
 0x1d6   : > { %v582_v54 = vpop.xlane.xlu0 %581 }
 0x1d7   : > { %v584_v28 = vpop.xlane.xlu1 %583  ;;  %v613_v55 = vadd.f32 %v612_v22, %v598_v53  ;;  %v599_v56 = vsub.f32 %v1144_v32, %v582_v54 }
 0x1d8   : > { %v600_v25 = vsub.f32 %v1154_v40, %v584_v28 }
 0x1d9   : > { %v614_v57 = vadd.f32 %v613_v55, %v599_v56 }
 0x1db   : > { %v615_v58 = vadd.f32 %v614_v57, %v600_v25 }
 0x1dd   : > { %v616_v59 = vrot.slane %v615_v58, 4 }
 0x1df   : > { %v617_v60 = vadd.f32 %v616_v59, %v615_v58 }
 0x1e1   : > { %v618_v27 = vrot.slane %v617_v60, 2 }
 0x1e3   : > { %v619_v61 = vadd.f32 %v618_v27, %v617_v60 }
 0x1e5   : > { %v620_v33 = vrot.slane %v619_v61, 1 }
 0x1e7   : > { %v621_v62 = vadd.f32 %v620_v33, %v619_v61 }
 0x1e9   : > { %v622_v30 = vmul.f32 0.00390625, %v621_v62 }
 0x1eb   : > { %623 = vst [vmem:[%s209_s11] sm:$0x1] %v622_v30 }
 0x1ec PF: > { %s15_s15 = sadd.s32 1, %s820_s15  }
 0x1ed   : > { %p12_p5 = scmp.ge.s32.totalorder %s15_s15, 4  }
 0x1ef   :  { %14 = sbr.rel (!%p12_p5) target bundleno = 1 (0x1), region = 74 }

</bundles_post_ra>
